<compile_context>
chip_gen: v5e
topology: v5e:2x2
jax: 0.10.0
libtpu: 0.0.40
codegen_flags: <defaults>
</compile_context>

<pallas_src>
import functools
import math

import jax
import jax.numpy as jnp
from jax.experimental import pallas as pl
from jax.experimental.pallas import tpu as pltpu


# ---------------------------------------------------------------------------
# Tiling helper
# ---------------------------------------------------------------------------
def _pick_tile(dim: int, target: int) -> int:
    """Largest tile <= target that evenly divides dim.

    Prefers the requested target (128/256-aligned), steps down in multiples of
    128 (lane width), and finally falls back to the full dim so the (8, 128)
    block constraint is satisfied via 'block == full array dim' for small/odd
    sizes (e.g. the demo shapes below).
    """
    if dim <= target:
        return dim
    if dim % target == 0:
        return target
    t = (target // 128) * 128
    while t >= 128:
        if dim % t == 0:
            return t
        t -= 128
    return dim


# ---------------------------------------------------------------------------
# Kernels
# ---------------------------------------------------------------------------
def _fc_act_kernel(x_ref, w_ref, b_ref, m_ref, pre_ref, post_ref, acc_ref,
                   *, activation, beta, compute_dtype):
    """out-tile = act(x @ W + b) * mask, accumulated over the K grid axis."""
    k = pl.program_id(2)

    @pl.when(k == 0)
    def _():
        acc_ref[...] = jnp.zeros_like(acc_ref)

    acc_ref[...] += jnp.dot(
        x_ref[...].astype(compute_dtype),
        w_ref[...].astype(compute_dtype),
        preferred_element_type=jnp.float32,
    )

    @pl.when(k == pl.num_programs(2) - 1)
    def _():
        pre = acc_ref[...] + b_ref[...]
        if activation == "relu":
            post = jnp.maximum(pre, 0.0)
        else:  # sigmoidlu: log(1 + exp(beta * x)) / beta
            post = jnp.log1p(jnp.exp(beta * pre)) / beta
        post = post * m_ref[...]
        pre_ref[...] = pre.astype(pre_ref.dtype)
        post_ref[...] = post.astype(post_ref.dtype)


def _proj_kernel(x_ref, w_ref, b_ref, o_ref, acc_ref, *, compute_dtype):
    """out-tile = x @ W + b, accumulated over the K grid axis."""
    k = pl.program_id(2)

    @pl.when(k == 0)
    def _():
        acc_ref[...] = jnp.zeros_like(acc_ref)

    acc_ref[...] += jnp.dot(
        x_ref[...].astype(compute_dtype),
        w_ref[...].astype(compute_dtype),
        preferred_element_type=jnp.float32,
    )

    @pl.when(k == pl.num_programs(2) - 1)
    def _():
        o_ref[...] = (acc_ref[...] + b_ref[...]).astype(o_ref.dtype)


# ---------------------------------------------------------------------------
# pallas_call wrappers
# ---------------------------------------------------------------------------
_COMPILER_PARAMS = pltpu.CompilerParams(
    dimension_semantics=("parallel", "parallel", "arbitrary"),
    # Sized for v7x's 64 MiB VMEM (also fine on v5e/v6e where physical is 128 MiB).
    vmem_limit_bytes=48 << 20,
)


def _fc_act_call(x2d, w, b, mask2d, *, activation, beta, compute_dtype,
                 tm=256, tn=512, tk=512):
    M, K = x2d.shape
    N = w.shape[1]
    tm, tn, tk = _pick_tile(M, tm), _pick_tile(N, tn), _pick_tile(K, tk)
    grid = (M // tm, N // tn, K // tk)

    cost = pl.CostEstimate(
        flops=2 * M * K * N,
        transcendentals=(M * N if activation == "sigmoidlu" else 0),
        bytes_accessed=(x2d.size * x2d.dtype.itemsize
                        + w.size * w.dtype.itemsize
                        + 2 * M * N * x2d.dtype.itemsize),
    )

    kern = functools.partial(_fc_act_kernel, activation=activation, beta=beta,
                             compute_dtype=compute_dtype)

    pre, post = pl.pallas_call(
        kern,
        out_shape=(jax.ShapeDtypeStruct((M, N), x2d.dtype),
                   jax.ShapeDtypeStruct((M, N), x2d.dtype)),
        grid_spec=pltpu.PrefetchScalarGridSpec(
            num_scalar_prefetch=0,
            grid=grid,
            in_specs=[
                pl.BlockSpec((tm, tk), lambda i, j, k: (i, k)),   # x tile
                pl.BlockSpec((tk, tn), lambda i, j, k: (k, j)),   # W tile
                pl.BlockSpec((1, tn), lambda i, j, k: (0, j)),    # bias (epilogue only)
                pl.BlockSpec((1, tn), lambda i, j, k: (0, j)),    # neuron mask
            ],
            out_specs=(
                pl.BlockSpec((tm, tn), lambda i, j, k: (i, j)),   # pre_activation
                pl.BlockSpec((tm, tn), lambda i, j, k: (i, j)),   # post_activation
            ),
            scratch_shapes=[pltpu.VMEM((tm, tn), jnp.float32)],
        ),
        compiler_params=_COMPILER_PARAMS,
        cost_estimate=cost,
    )(x2d, w, b.reshape(1, N), mask2d)
    return pre, post


def _proj_call(x2d, w, b, *, compute_dtype, tm=256, tn=512, tk=512):
    M, K = x2d.shape
    N = w.shape[1]
    tm, tn, tk = _pick_tile(M, tm), _pick_tile(N, tn), _pick_tile(K, tk)
    grid = (M // tm, N // tn, K // tk)

    cost = pl.CostEstimate(
        flops=2 * M * K * N,
        transcendentals=0,
        bytes_accessed=(x2d.size * x2d.dtype.itemsize
                        + w.size * w.dtype.itemsize
                        + M * N * x2d.dtype.itemsize),
    )

    kern = functools.partial(_proj_kernel, compute_dtype=compute_dtype)

    out = pl.pallas_call(
        kern,
        out_shape=jax.ShapeDtypeStruct((M, N), x2d.dtype),
        grid_spec=pltpu.PrefetchScalarGridSpec(
            num_scalar_prefetch=0,
            grid=grid,
            in_specs=[
                pl.BlockSpec((tm, tk), lambda i, j, k: (i, k)),
                pl.BlockSpec((tk, tn), lambda i, j, k: (k, j)),
                pl.BlockSpec((1, tn), lambda i, j, k: (0, j)),
            ],
            out_specs=pl.BlockSpec((tm, tn), lambda i, j, k: (i, j)),
            scratch_shapes=[pltpu.VMEM((tm, tn), jnp.float32)],
        ),
        compiler_params=_COMPILER_PARAMS,
        cost_estimate=cost,
    )(x2d, w, b.reshape(1, N))
    return out


# ---------------------------------------------------------------------------
# MLP forward (matches MLP.forward semantics, inference/eval-mode dropout)
# ---------------------------------------------------------------------------
def mlp_forward(x, params, neuron_mask=None, *, activation="relu",
                sigmoidlu_beta=1.0, compute_dtype=jnp.float32):
    """x: (batch, seq, hidden). params = (w_fc, b_fc, w_proj, b_proj) with
    w_fc: (hidden, intermediate), w_proj: (intermediate, hidden).
    Returns (output, intermediate_dict) like the PyTorch module."""
    if activation not in ("relu", "sigmoidlu"):
        raise ValueError(f"unsupported activation: {activation}")
    batch, seq, hidden = x.shape
    w_fc, b_fc, w_proj, b_proj = params
    inter = w_fc.shape[1]
    m = batch * seq
    x2d = x.reshape(m, hidden)

    if neuron_mask is None:
        mask2d = jnp.ones((1, inter), x.dtype)
    else:
        mask2d = jnp.asarray(neuron_mask, x.dtype).reshape(1, inter)

    pre2d, post2d = _fc_act_call(x2d, w_fc, b_fc, mask2d,
                                 activation=activation, beta=sigmoidlu_beta,
                                 compute_dtype=compute_dtype)
    out2d = _proj_call(post2d, w_proj, b_proj, compute_dtype=compute_dtype)
    # TODO(synk): nn.Dropout(resid_pdrop) in training mode (inverted-dropout
    # scaling with RNG) is not applied; forward here is eval-mode (identity).

    out = out2d.reshape(batch, seq, hidden)
    intermediate = {
        "input": x,
        "pre_activation": pre2d.reshape(batch, seq, inter),
        "post_activation": post2d.reshape(batch, seq, inter),
        "output": out,
    }
    return out, intermediate


# ---------------------------------------------------------------------------
# Parameter init (mimics nn.Linear defaults: U(-1/sqrt(fan_in), 1/sqrt(fan_in)))
# ---------------------------------------------------------------------------
def init_mlp_params(key, hidden_size, intermediate_size):
    k1, k2, k3, k4 = jax.random.split(key, 4)
    bfc = 1.0 / math.sqrt(hidden_size)
    bpr = 1.0 / math.sqrt(intermediate_size)
    w_fc = jax.random.uniform(k1, (hidden_size, intermediate_size), jnp.float32,
                              minval=-bfc, maxval=bfc)
    b_fc = jax.random.uniform(k2, (intermediate_size,), jnp.float32,
                              minval=-bfc, maxval=bfc)
    w_proj = jax.random.uniform(k3, (intermediate_size, hidden_size), jnp.float32,
                                minval=-bpr, maxval=bpr)
    b_proj = jax.random.uniform(k4, (hidden_size,), jnp.float32,
                                minval=-bpr, maxval=bpr)
    return w_fc, b_fc, w_proj, b_proj


if __name__ == "__main__":
    batch, seq, hidden, intermediate = 2, 8, 32, 128

    key = jax.random.PRNGKey(0)
    kx, kp = jax.random.split(key)
    x = jax.random.normal(kx, (batch, seq, hidden), dtype=jnp.float32)
    params = init_mlp_params(kp, hidden, intermediate)
    w_fc, b_fc, w_proj, b_proj = params

    # --- f32 path (matches PyTorch forward numerics) ---
    out, inter = mlp_forward(x, params, neuron_mask=None, activation="relu")
    out = jax.block_until_ready(out)

    x2d = x.reshape(-1, hidden)
    pre_ref = x2d @ w_fc + b_fc
    post_ref = jnp.maximum(pre_ref, 0.0)
    out_ref = (post_ref @ w_proj + b_proj).reshape(batch, seq, hidden)

    assert out.shape == (batch, seq, hidden)
    assert inter["pre_activation"].shape == (batch, seq, intermediate)
    assert jnp.allclose(inter["pre_activation"].reshape(-1, intermediate),
                        pre_ref, atol=1e-5, rtol=1e-5)
    assert jnp.allclose(inter["post_activation"].reshape(-1, intermediate),
                        post_ref, atol=1e-5, rtol=1e-5)
    assert jnp.allclose(out, out_ref, atol=1e-5, rtol=1e-5)

    # --- bf16 MXU path (weights/activations cast to bf16, f32 accumulate) ---
    out_bf16, _ = mlp_forward(x, params, neuron_mask=None, activation="relu",
                              compute_dtype=jnp.bfloat16)
    out_bf16 = jax.block_until_ready(out_bf16)
    assert jnp.allclose(out_bf16, out_ref, atol=5e-2, rtol=5e-2)

    print("KERNEL_OK")
</pallas_src>

<mosaic_0001>
module attributes {stable_mosaic.version = 11 : i64} {
  func.func @_fc_act_kernel(%arg0: i32, %arg1: i32, %arg2: i32, %arg3: memref<16x32xf32, #tpu.memory_space<vmem>>, %arg4: memref<32x128xf32, #tpu.memory_space<vmem>>, %arg5: memref<1x128xf32, #tpu.memory_space<vmem>>, %arg6: memref<1x128xf32, #tpu.memory_space<vmem>>, %arg7: memref<16x128xf32, #tpu.memory_space<vmem>>, %arg8: memref<16x128xf32, #tpu.memory_space<vmem>>, %arg9: memref<16x128xf32, #tpu.memory_space<vmem>>) attributes {dimension_semantics = [#tpu.dimension_semantics<parallel>, #tpu.dimension_semantics<parallel>, #tpu.dimension_semantics<arbitrary>], iteration_bounds = array<i64: 1, 1, 1>, scalar_prefetch = 0 : i64, scratch_operands = 1 : i64, tpu.core_type = #tpu.core_type<tc>, window_params = [{transform_indices = @transform_0, window_bounds = array<i64: 16, 32>}, {transform_indices = @transform_1, window_bounds = array<i64: 32, 128>}, {transform_indices = @transform_2, window_bounds = array<i64: 1, 128>}, {transform_indices = @transform_3, window_bounds = array<i64: 1, 128>}, {transform_indices = @transform_4, window_bounds = array<i64: 16, 128>}, {transform_indices = @transform_5, window_bounds = array<i64: 16, 128>}]} {
    %c0_i32 = arith.constant 0 : i32
    %0 = arith.cmpi eq, %arg2, %c0_i32 : i32
    %1 = arith.extui %0 : i1 to i32
    %c0_i32_0 = arith.constant 0 : i32
    %2 = arith.cmpi ne, %1, %c0_i32_0 : i32
    scf.if %2 {
      %cst_10 = arith.constant 0.000000e+00 : f32
      %12 = vector.broadcast %cst_10 : f32 to vector<16x128xf32>
      %c0_11 = arith.constant 0 : index
      %c0_12 = arith.constant 0 : index
      %13 = vector.load %arg9[%c0_11, %c0_12] : memref<16x128xf32, #tpu.memory_space<vmem>>, vector<16x128xf32>
      tpu.vector_store %arg9[%c0_11, %c0_12], %12 {strides = array<i32>} : memref<16x128xf32, #tpu.memory_space<vmem>>, vector<16x128xf32>,
    } else {
    }
    %c0 = arith.constant 0 : index
    %c0_1 = arith.constant 0 : index
    %3 = vector.load %arg9[%c0, %c0_1] : memref<16x128xf32, #tpu.memory_space<vmem>>, vector<16x128xf32>
    %c0_2 = arith.constant 0 : index
    %c0_3 = arith.constant 0 : index
    %4 = vector.load %arg3[%c0_2, %c0_3] : memref<16x32xf32, #tpu.memory_space<vmem>>, vector<16x32xf32>
    %c0_4 = arith.constant 0 : index
    %c0_5 = arith.constant 0 : index
    %5 = vector.load %arg4[%c0_4, %c0_5] : memref<32x128xf32, #tpu.memory_space<vmem>>, vector<32x128xf32>
    %cst = arith.constant dense<0.000000e+00> : vector<16x128xf32>
    %6 = tpu.matmul %4, %5, %cst {dimension_numbers = #tpu.dot_dimension_numbers<[1], [0], [0], [1], [0, 0, 1, 1], [], []>} : vector<16x32xf32>, vector<32x128xf32>, vector<16x128xf32> -> vector<16x128xf32>
    %7 = arith.addf %3, %6 : vector<16x128xf32>
    %c0_6 = arith.constant 0 : index
    %c0_7 = arith.constant 0 : index
    %8 = vector.load %arg9[%c0_6, %c0_7] : memref<16x128xf32, #tpu.memory_space<vmem>>, vector<16x128xf32>
    tpu.vector_store %arg9[%c0_6, %c0_7], %7 {strides = array<i32>} : memref<16x128xf32, #tpu.memory_space<vmem>>, vector<16x128xf32>,
    %c0_i32_8 = arith.constant 0 : i32
    %9 = arith.cmpi eq, %arg2, %c0_i32_8 : i32
    %10 = arith.extui %9 : i1 to i32
    %c0_i32_9 = arith.constant 0 : i32
    %11 = arith.cmpi ne, %10, %c0_i32_9 : i32
    scf.if %11 {
      %c0_10 = arith.constant 0 : index
      %c0_11 = arith.constant 0 : index
      %12 = vector.load %arg9[%c0_10, %c0_11] : memref<16x128xf32, #tpu.memory_space<vmem>>, vector<16x128xf32>
      %c0_12 = arith.constant 0 : index
      %c0_13 = arith.constant 0 : index
      %13 = vector.load %arg5[%c0_12, %c0_13] : memref<1x128xf32, #tpu.memory_space<vmem>>, vector<1x128xf32>
      %14 = vector.broadcast %13 : vector<1x128xf32> to vector<16x128xf32>
      %15 = arith.addf %12, %14 : vector<16x128xf32>
      %cst_14 = arith.constant 0.000000e+00 : f32
      %16 = vector.broadcast %cst_14 : f32 to vector<16x128xf32>
      %17 = arith.maximumf %15, %16 : vector<16x128xf32>
      %c0_15 = arith.constant 0 : index
      %c0_16 = arith.constant 0 : index
      %18 = vector.load %arg6[%c0_15, %c0_16] : memref<1x128xf32, #tpu.memory_space<vmem>>, vector<1x128xf32>
      %19 = vector.broadcast %18 : vector<1x128xf32> to vector<16x128xf32>
      %20 = arith.mulf %17, %19 : vector<16x128xf32>
      %c0_17 = arith.constant 0 : index
      %c0_18 = arith.constant 0 : index
      %21 = vector.load %arg7[%c0_17, %c0_18] : memref<16x128xf32, #tpu.memory_space<vmem>>, vector<16x128xf32>
      tpu.vector_store %arg7[%c0_17, %c0_18], %15 {strides = array<i32>} : memref<16x128xf32, #tpu.memory_space<vmem>>, vector<16x128xf32>,
      %c0_19 = arith.constant 0 : index
      %c0_20 = arith.constant 0 : index
      %22 = vector.load %arg8[%c0_19, %c0_20] : memref<16x128xf32, #tpu.memory_space<vmem>>, vector<16x128xf32>
      tpu.vector_store %arg8[%c0_19, %c0_20], %20 {strides = array<i32>} : memref<16x128xf32, #tpu.memory_space<vmem>>, vector<16x128xf32>,
    } else {
    }
    return
  }
  func.func @transform_0(%arg0: i32, %arg1: i32, %arg2: i32) -> (i32, i32) {
    %c0_i32 = arith.constant 0 : i32
    return %arg0, %arg2 : i32, i32
  }
  func.func @transform_1(%arg0: i32, %arg1: i32, %arg2: i32) -> (i32, i32) {
    %c0_i32 = arith.constant 0 : i32
    return %arg2, %arg1 : i32, i32
  }
  func.func @transform_2(%arg0: i32, %arg1: i32, %arg2: i32) -> (i32, i32) {
    %c0_i32 = arith.constant 0 : i32
    %c0_i32_0 = arith.constant 0 : i32
    return %c0_i32, %arg1 : i32, i32
  }
  func.func @transform_3(%arg0: i32, %arg1: i32, %arg2: i32) -> (i32, i32) {
    %c0_i32 = arith.constant 0 : i32
    %c0_i32_0 = arith.constant 0 : i32
    return %c0_i32, %arg1 : i32, i32
  }
  func.func @transform_4(%arg0: i32, %arg1: i32, %arg2: i32) -> (i32, i32) {
    %c0_i32 = arith.constant 0 : i32
    return %arg0, %arg1 : i32, i32
  }
  func.func @transform_5(%arg0: i32, %arg1: i32, %arg2: i32) -> (i32, i32) {
    %c0_i32 = arith.constant 0 : i32
    return %arg0, %arg1 : i32, i32
  }
}

</mosaic_0001>

<bundles_post_ra>
// kernel: tpu_custom_call.1
= control target key start
LH: loop header
LB: loop body
LE: loop exit
PB: predicated region body
PF: predicated region fallthrough
CT: control target
= control target key end

     0   :  { %11 = vsyncpa [#allocation4], 0  ;;  %s346_s0 = inlined_call_operand.hbm [shape: f32[16,32], index: 0, kind: input, shape index: {}]   ;;  %s347_s1 = inlined_call_operand.hbm [shape: f32[32,128], index: 1, kind: input, shape index: {}]   ;;  %s348_s2 = inlined_call_operand.vmem [shape: f32[1,128], index: 2, kind: input, shape index: {}]   ;;  %s349_s3 = inlined_call_operand.vmem [shape: f32[1,128], index: 3, kind: input, shape index: {}]   ;;  %s350_s4 = inlined_call_operand.hbm [shape: f32[16,128], index: 4, kind: output, shape index: {0}]   ;;  %s351_s5 = inlined_call_operand.hbm [shape: f32[16,128], index: 5, kind: output, shape index: {1}]  }
   0x1   :  { %12 = vsyncpa [#allocation7], 0 }
   0x2   :  { %13 = vsyncpa [#allocation5], 0 }
   0x3   :  { %14 = vsyncpa [#allocation10], 0  ;;  %s19_s20 = sshll.u32 %s346_s0, 4  ;;  %s280_s21 = smov [#allocation3]   ;;  %s20_s20 = int_to_ptr.hbm [resolvable:$true] %s19_s20 }
   0x4   :  { %s21_s22 = sshll.u32 %s280_s21, 4  ;;  %s32_s25 = sshll.u32 %s347_s1, 4  ;;  %s22_s22 = int_to_ptr.vmem [resolvable:$true] %s21_s22  ;;  %s33_s25 = int_to_ptr.hbm [resolvable:$true] %s32_s25 }
   0x5   :  { %s281_s26 = smov 128   ;;  %s282_s27 = smov 8  }
   0x6   :  { %27 = dma.hbm_to_vmem [thread:$0]  %s20_s20, 256, %s22_s22, [#allocation4], %s281_s26, %s281_s26, %s282_s27  }
   0x7   :  { %s283_s28 = smov [#allocation6]  }
   0x8   :  { %s34_s29 = sshll.u32 %s283_s28, 4  ;;  %s35_s29 = int_to_ptr.vmem [resolvable:$true] %s34_s29 }
   0x9   :  { %40 = dma.hbm_to_vmem [thread:$0]  %s33_s25, 512, %s35_s29, [#allocation7], %s281_s26, %s281_s26, %s282_s27  }
   0xa   :  { %272 = dma.done.wait [#allocation4], 256  }
   0xb   :  { %273 = vsyncadd [#allocation4], 4294967040 }
   0xc   :  { %274 = dma.done.wait [#allocation7], 512  }
   0xd   :  { %275 = vsyncadd [#allocation7], 4294966784  ;;  %v66_v0 = vld [vmem:[#allocation6 + $0x18] sm:$0xff]  ;;  %v65_v1 = vld [vmem:[#allocation6 + $0x10] sm:$0xff]  ;;  %vm67_vm0 = vcmask 261120   ;;  %s284_s30 = smov [#allocation8]  }
   0xe   :  { %86 = vmatpush.msra.mxu0 %v66_v0  ;;  %164 = vmatpush.msra.mxu1 %v66_v0  ;;  %v64_v2 = vld [vmem:[#allocation6 + $0x8] sm:$0xff]  ;;  %v63_v3 = vld [vmem:[#allocation6] sm:$0xff]  ;;  %v61_v4 = vld [vmem:[#allocation3] sm:$0xff]  ;;  %s128_s6 = sshll.u32 %s284_s30, 4  ;;  %s130_s9 = sshll.u32 %s350_s4, 4  ;;  %s129_s6 = int_to_ptr.vmem [resolvable:$true] %s128_s6  ;;  %s131_s9 = int_to_ptr.hbm [resolvable:$true] %s130_s9 }
   0xf   :  { %v62_v5 = vld [vmem:[#allocation3 + $0x8] sm:$0xff]  ;;  %v174_v6 = vld [vmem:[%s348_s2] ss:$0 sm:$0xff]  ;;  %s285_s2 = smov [#allocation9]   ;;  %s143_s15 = sshll.u32 %s351_s5, 4  ;;  %s144_s15 = int_to_ptr.hbm [resolvable:$true] %s143_s15 }
  0x10   :  { %87 = vmatpush.msra.mxu0 %v65_v1  ;;  %165 = vmatpush.msra.mxu1 %v65_v1  ;;  %v175_v10 = vld [vmem:[%s349_s3] ss:$0 sm:$0xff]  ;;  %s141_s12 = sshll.u32 %s285_s2, 4  ;;  %s142_s12 = int_to_ptr.vmem [resolvable:$true] %s141_s12 }
  0x12   :  { %88 = vmatpush.msra.mxu0 %v64_v2  ;;  %166 = vmatpush.msra.mxu1 %v64_v2 }
  0x14   :  { %89 = vmatpush.msra.mxu0 %v63_v3  ;;  %167 = vmatpush.msra.mxu1 %v63_v3 }
  0x15   :  { %162 = vmatmul.msk.f32.vlgmr.msra.gmra.mxu0 %vm67_vm0, %v61_v4  ;;  %163 = vmatmul.msk.f32.vlgmr.msra.gmra.mxu1 %vm67_vm0, %v62_v5 }
  0x92   :  { %v91_v7 = vpop.f32.mrf.mxu0  ;;  %v94_v8 = vpop.f32.mrf.mxu1 }
  0x93   :  { %v110_v9 = vadd.f32 %v174_v6, %v91_v7  ;;  %v111_v11 = vadd.f32 %v174_v6, %v94_v8 }
  0x95   :  { %v112_v12 = vmax.f32 %v110_v9, 0.0  ;;  %120 = vst [vmem:[#allocation8] sm:$0xff] %v110_v9  ;;  %v113_v13 = vmax.f32 %v111_v11, 0.0 }
  0x96   :  { %121 = vst [vmem:[#allocation8 + $0x8] sm:$0xff] %v111_v11 }
  0x97   :  { %v118_v14 = vmul.f32 %v175_v10, %v112_v12  ;;  %v119_v15 = vmul.f32 %v175_v10, %v113_v13  ;;  %136 = dma.vmem_to_hbm [thread:$0]  %s129_s6, 256, %s131_s9, [#allocation5], %s281_s26, %s281_s26, %s282_s27  }
  0x99   :  { %122 = vst [vmem:[#allocation9] sm:$0xff] %v118_v14 }
  0x9a   :  { %123 = vst [vmem:[#allocation9 + $0x8] sm:$0xff] %v119_v15 }
  0x9b   :  { %149 = dma.vmem_to_hbm [thread:$0]  %s142_s12, 256, %s144_s15, [#allocation10], %s281_s26, %s281_s26, %s282_s27  }
  0x9c   :  { %276 = dma.done.wait [#allocation5], 256  }
  0x9d   :  { %277 = vsyncadd [#allocation5], 4294967040 }
  0x9e   :  { %278 = dma.done.wait [#allocation10], 256  }
  0x9f   :  { %279 = vsyncadd [#allocation10], 4294967040 }
  0xa0   :  { %158 = vsyncpa [#allocation4], 1 }
  0xa1   :  { %159 = vsyncpa [#allocation7], 1 }
  0xa2   :  { %160 = vsyncpa [#allocation5], 1 }
  0xa3   :  { %161 = vsyncpa [#allocation10], 1 }

</bundles_post_ra>
